<compile_context>
chip_gen: v6e
topology: v6e:2x2x1
jax: 0.10.0
libtpu: 0.0.40
codegen_flags: <defaults>
</compile_context>

<pallas_src>
import functools

import jax
import jax.numpy as jnp
from jax.experimental import pallas as pl
from jax.experimental.pallas import tpu as pltpu

# Small, self-consistent test configuration (scaled down from
# embeddings_dims=384; kept a multiple of 128 for lane-dense I/O).
BATCH = 2
SEQ = 128                  # ModelArgs.block_size
EMBED = 128                # embeddings_dims (scaled down, multiple of 128)
HIDDEN = EMBED * 2         # self.hidden_dims = embeddings_dims * 2

GATE_DTYPE = jnp.bfloat16  # bf16 gating for v6e/v7x; use jnp.float32 on v5e
OUT_DTYPE = jnp.bfloat16   # bf16 output halves HBM writeback


def swiglu_kernel(x_ref, w12_ref, w3_ref, o_ref, *, hidden, gate_dtype):
    """One token tile: out = (swish(x@W1) * (x@W2)) @ W3, with W1|W2 fused."""
    # In-kernel activation cast (f32 tile -> bf16); hidden under the matmuls.
    x = x_ref[...].astype(jnp.bfloat16)                            # (T, D)

    # Single wide up-projection: (T, D) @ (D, 2H) -> (T, 2H), f32 accumulation.
    h = jnp.dot(x, w12_ref[...], preferred_element_type=jnp.float32)
    # hidden is a multiple of 128, so both slices land on lane-tile boundaries.
    h1 = h[:, :hidden].astype(gate_dtype)                          # l1(x)
    h2 = h[:, hidden:].astype(gate_dtype)                          # l2(x)

    # SwiGLU gating: swish(h1) * h2 (bf16 VPU/EUP on v6e/v7x).
    gated = (h1 * jax.nn.sigmoid(h1)) * h2                         # (T, H)

    # Down-projection: (T, H) @ (H, D) -> (T, D), bf16 operands / f32 acc.
    out = jnp.dot(gated.astype(jnp.bfloat16), w3_ref[...],
                  preferred_element_type=jnp.float32)
    o_ref[...] = out.astype(o_ref.dtype)


def prepare_params(params, weight_dtype=jnp.bfloat16):
    """One-time weight fusion + cast. Call at init, NOT on every forward."""
    w12 = jnp.concatenate([params["w1"], params["w2"]], axis=1).astype(weight_dtype)
    w3 = params["w3"].astype(weight_dtype)
    return {"w12": w12, "w3": w3}


def _pick_tile_n(n):
    """Largest 128-multiple tile (<=512) dividing n, preferring >=2 grid steps
    so both v7x TensorCores get work; falls back to a single fat step."""
    for t in (512, 384, 256, 128):
        if n % t == 0 and n // t >= 2:
            return t
    for t in (512, 384, 256, 128):
        if n % t == 0:
            return t
    raise ValueError(f"token count {n} must be a multiple of 128")


def swiglu_expert_pallas(x, fused_params, *, out_dtype=OUT_DTYPE, tile_n=None):
    """x: (B, S, D) f32 (or bf16) -> (B, S, D) out_dtype."""
    B, S, D = x.shape
    N = B * S
    w12 = fused_params["w12"]                                      # (D, 2H) bf16
    w3 = fused_params["w3"]                                        # (H, D) bf16
    H2 = w12.shape[1]
    H = H2 // 2
    assert w12.shape == (D, H2) and w3.shape == (H, D)
    assert D % 128 == 0 and H % 128 == 0, "keep D and H lane-aligned (x128)"

    if tile_n is None:
        tile_n = _pick_tile_n(N)
    assert N % tile_n == 0

    x_flat = x.reshape(N, D)            # no dtype cast here (done in-kernel)
    grid = (N // tile_n,)

    # Advisory cost estimate for XLA's scheduler.
    out_bytes = N * D * jnp.dtype(out_dtype).itemsize
    cost = pl.CostEstimate(
        flops=2 * N * D * H2 + 2 * N * H * D,
        transcendentals=N * H,
        bytes_accessed=(x_flat.size * x_flat.dtype.itemsize
                        + 2 * (D * H2 + H * D)          # bf16 weights
                        + out_bytes),
    )

    # VMEM budget: actual working set (double-buffered tiles + resident
    # weights) plus headroom; stays far below the 64 MiB physical VMEM on v7x.
    vmem_need = (2 * tile_n * D * x_flat.dtype.itemsize            # x tiles
                 + 2 * tile_n * D * jnp.dtype(out_dtype).itemsize  # out tiles
                 + 2 * 2 * (D * H2 + H * D)                        # weights (2-buf)
                 + 2 * tile_n * H2 * 4)                            # f32 intermediate
    vmem_limit = min(int(vmem_need * 1.5) + (4 << 20), 48 << 20)

    kernel = functools.partial(swiglu_kernel, hidden=H, gate_dtype=GATE_DTYPE)

    out = pl.pallas_call(
        kernel,
        out_shape=jax.ShapeDtypeStruct((N, D), out_dtype),
        grid_spec=pltpu.PrefetchScalarGridSpec(
            num_scalar_prefetch=0,
            grid=grid,
            in_specs=[
                pl.BlockSpec((tile_n, D), lambda i: (i, 0)),   # x tile (streamed)
                pl.BlockSpec((D, H2), lambda i: (0, 0)),       # fused W1|W2 (resident)
                pl.BlockSpec((H, D), lambda i: (0, 0)),        # W3 (resident)
            ],
            out_specs=pl.BlockSpec((tile_n, D), lambda i: (i, 0)),
        ),
        compiler_params=pltpu.CompilerParams(
            dimension_semantics=("parallel",),
            vmem_limit_bytes=vmem_limit,
        ),
        cost_estimate=cost,
    )(x_flat, w12, w3)

    return out.reshape(B, S, D)


# ---------------- pure-JAX f32 reference (mirrors the PyTorch forward) -------
def swiglu_expert_ref(x, params):
    h1 = x @ params["w1"]
    h2 = x @ params["w2"]
    return (h1 * jax.nn.sigmoid(h1) * h2) @ params["w3"]


def init_params(key):
    """PyTorch Linear-style init: uniform(-1/sqrt(fan_in), +1/sqrt(fan_in))."""
    k1, k2, k3 = jax.random.split(key, 3)
    u = lambda k, shape, fan_in: jax.random.uniform(
        k, shape, jnp.float32, -1.0 / jnp.sqrt(fan_in), 1.0 / jnp.sqrt(fan_in))
    return {
        "w1": u(k1, (EMBED, HIDDEN), EMBED),    # linear_layer1.weight.T
        "w2": u(k2, (EMBED, HIDDEN), EMBED),    # linear_layer2.weight.T
        "w3": u(k3, (HIDDEN, EMBED), HIDDEN),   # linear_layer3.weight.T
    }


if __name__ == "__main__":
    key = jax.random.PRNGKey(0)
    kx, kp = jax.random.split(key)
    x = jax.random.normal(kx, (BATCH, SEQ, EMBED), jnp.float32)
    params = init_params(kp)

    # Hoisted out of the hot path: fuse + cast weights exactly once.
    fused = prepare_params(params)

    fwd = jax.jit(swiglu_expert_pallas)
    out = fwd(x, fused)
    out = jax.block_until_ready(out)

    ref = swiglu_expert_ref(x, params)
    assert out.shape == (BATCH, SEQ, EMBED)
    # bf16 activations/weights/gating with f32 accumulation -> loosened
    # tolerance vs the f32 reference (expected precision difference, not a bug).
    assert jnp.allclose(out.astype(jnp.float32), ref, rtol=2.5e-2, atol=2.5e-2), \
        "mismatch vs reference"
    print("KERNEL_OK")
</pallas_src>

<mosaic_0001>
module attributes {stable_mosaic.version = 11 : i64} {
  func.func @swiglu_kernel(%arg0: i32, %arg1: memref<128x128xf32, #tpu.memory_space<vmem>>, %arg2: memref<128x512xbf16, #tpu.memory_space<vmem>>, %arg3: memref<256x128xbf16, #tpu.memory_space<vmem>>, %arg4: memref<128x128xbf16, #tpu.memory_space<vmem>>) attributes {dimension_semantics = [#tpu.dimension_semantics<parallel>], iteration_bounds = array<i64: 2>, scalar_prefetch = 0 : i64, scratch_operands = 0 : i64, tpu.core_type = #tpu.core_type<tc>, window_params = [{transform_indices = @transform_0, window_bounds = array<i64: 128, 128>}, {pipeline_mode = #tpu.pipeline_mode<synchronous>, transform_indices = @transform_1, window_bounds = array<i64: 128, 512>}, {pipeline_mode = #tpu.pipeline_mode<synchronous>, transform_indices = @transform_2, window_bounds = array<i64: 256, 128>}, {transform_indices = @transform_3, window_bounds = array<i64: 128, 128>}]} {
    %c0 = arith.constant 0 : index
    %c0_0 = arith.constant 0 : index
    %0 = vector.load %arg1[%c0, %c0_0] : memref<128x128xf32, #tpu.memory_space<vmem>>, vector<128x128xf32>
    %1 = arith.truncf %0 : vector<128x128xf32> to vector<128x128xbf16>
    %c0_1 = arith.constant 0 : index
    %c0_2 = arith.constant 0 : index
    %2 = vector.load %arg2[%c0_1, %c0_2] : memref<128x512xbf16, #tpu.memory_space<vmem>>, vector<128x512xbf16>
    %cst = arith.constant dense<0.000000e+00> : vector<128x512xf32>
    %3 = tpu.matmul %1, %2, %cst {dimension_numbers = #tpu.dot_dimension_numbers<[1], [0], [0], [1], [0, 0, 1, 1], [], []>} : vector<128x128xbf16>, vector<128x512xbf16>, vector<128x512xf32> -> vector<128x512xf32>
    %4 = vector.extract_strided_slice %3 {offsets = [0, 0], sizes = [128, 256], strides = [1, 1]} : vector<128x512xf32> to vector<128x256xf32>
    %5 = arith.truncf %4 : vector<128x256xf32> to vector<128x256xbf16>
    %6 = vector.extract_strided_slice %3 {offsets = [0, 256], sizes = [128, 256], strides = [1, 1]} : vector<128x512xf32> to vector<128x256xf32>
    %7 = arith.truncf %6 : vector<128x256xf32> to vector<128x256xbf16>
    %8 = arith.negf %5 : vector<128x256xbf16>
    %9 = math.exp %8 : vector<128x256xbf16>
    %cst_3 = arith.constant 1.000000e+00 : bf16
    %10 = vector.broadcast %cst_3 : bf16 to vector<128x256xbf16>
    %11 = arith.addf %10, %9 : vector<128x256xbf16>
    %12 = arith.divf %10, %11 : vector<128x256xbf16>
    %13 = arith.mulf %5, %12 : vector<128x256xbf16>
    %14 = arith.mulf %13, %7 : vector<128x256xbf16>
    %c0_4 = arith.constant 0 : index
    %c0_5 = arith.constant 0 : index
    %15 = vector.load %arg3[%c0_4, %c0_5] : memref<256x128xbf16, #tpu.memory_space<vmem>>, vector<256x128xbf16>
    %cst_6 = arith.constant dense<0.000000e+00> : vector<128x128xf32>
    %16 = tpu.matmul %14, %15, %cst_6 {dimension_numbers = #tpu.dot_dimension_numbers<[1], [0], [0], [1], [0, 0, 1, 1], [], []>} : vector<128x256xbf16>, vector<256x128xbf16>, vector<128x128xf32> -> vector<128x128xf32>
    %17 = arith.truncf %16 : vector<128x128xf32> to vector<128x128xbf16>
    %c0_7 = arith.constant 0 : index
    %c0_8 = arith.constant 0 : index
    %18 = vector.load %arg4[%c0_7, %c0_8] : memref<128x128xbf16, #tpu.memory_space<vmem>>, vector<128x128xbf16>
    tpu.vector_store %arg4[%c0_7, %c0_8], %17 {strides = array<i32>} : memref<128x128xbf16, #tpu.memory_space<vmem>>, vector<128x128xbf16>,
    return
  }
  func.func @transform_0(%arg0: i32) -> (i32, i32) {
    %c0_i32 = arith.constant 0 : i32
    %c0_i32_0 = arith.constant 0 : i32
    return %arg0, %c0_i32 : i32, i32
  }
  func.func @transform_1(%arg0: i32) -> (i32, i32) {
    %c0_i32 = arith.constant 0 : i32
    %c0_i32_0 = arith.constant 0 : i32
    %c0_i32_1 = arith.constant 0 : i32
    return %c0_i32, %c0_i32_0 : i32, i32
  }
  func.func @transform_2(%arg0: i32) -> (i32, i32) {
    %c0_i32 = arith.constant 0 : i32
    %c0_i32_0 = arith.constant 0 : i32
    %c0_i32_1 = arith.constant 0 : i32
    return %c0_i32, %c0_i32_0 : i32, i32
  }
  func.func @transform_3(%arg0: i32) -> (i32, i32) {
    %c0_i32 = arith.constant 0 : i32
    %c0_i32_0 = arith.constant 0 : i32
    return %arg0, %c0_i32 : i32, i32
  }
}

</mosaic_0001>

<bundles_post_ra>
// kernel: swiglu_expert_pallas.1
= control target key start
LH: loop header
LB: loop body
LE: loop exit
PB: predicated region body
PF: predicated region fallthrough
CT: control target
= control target key end

     0   :  { %8 = vsyncpa [#allocation3], 0  ;;  %s2205_s0 = inlined_call_operand.hbm [shape: f32[256,128], index: 0, kind: input, shape index: {}]   ;;  %s2206_s1 = inlined_call_operand.hbm [shape: bf16[128,512], index: 1, kind: input, shape index: {}]   ;;  %s2207_s2 = inlined_call_operand.hbm [shape: bf16[256,128], index: 2, kind: input, shape index: {}]   ;;  %s2208_s3 = inlined_call_operand.hbm [shape: bf16[256,128], index: 3, kind: output, shape index: {}]  }
   0x1   :  { %10 = vsyncpa [#allocation3 + $0x1], 0 }
   0x2   :  { %11 = vsyncpa [#allocation6], 0 }
   0x3   :  { %12 = vsyncpa [#allocation4], 0 }
   0x4   :  { %14 = vsyncpa [#allocation4 + $0x1], 0  ;;  %s1881_s12 = smov 0   ;;  %s1883_s13 = smov 0  }
   0x5   :  { %s1885_s14 = smov 0   ;;  %s1887_s15 = smov 0  }
   0x6 LB: > { %s1902_s16 = sadd.s32 4294967295, %s1846_s15   ;;  %s1251_s17 = sadd.s32 4294967294, %s1846_s15   ;;  %s1846_s15 = sphi %s1887_s15, %s2230_s15   ;;  %s1842_s14 = sphi %s1885_s14, %s2229_s14   ;;  %s1838_s13 = sphi %s1883_s13, %s2228_s13   ;;  %s1834_s12 = sphi %s1881_s12, %s2227_s12  }
   0x7   : > { %p40_p0 = scmp.ne.s32.totalorder %s1838_s13, %s1834_s12  ;;  %p2209_p1 = scmp.eq.s32.totalorder %s1902_s16, 0 }
   0x8   : > { %p112_p3 = scmp.eq.s32.totalorder %s1251_s17, 1  ;;  %p1252_p5 = scmp.ge.s32.totalorder %s1846_s15, 1 }
   0x9   : > { %p1911_p4 = por %p2209_p1, %p40_p0  ;;  %p119_p7 = scmp.lt.s32.totalorder %s1846_s15, 3 }
   0xa   : > { %p1916_p6 = por %p112_p3, %p40_p0  ;;  %s1848_s21 = smov [#allocation5]  }
   0xb   : > { %s2213_s18 = scalar_select %p1911_p4, 1, 0 }
   0xc   : > { %s2214_s19 = scalar_select %p1916_p6, 1, 0 }
   0xd   : > { %p1921_p8 = pnand %p1252_p5, %p119_p7  ;;  %s131_s22 = sshll.u32 %s1848_s21, 4  ;;  %s132_s22 = int_to_ptr.vmem [resolvable:$true] %s131_s22 }
   0xe   : > { %s1849_s24 = smov [#allocation7]   ;;  %s1709_s26 = scalar_lea.vmem %s132_s22, 4096 }
   0xf   : > { %s2215_s20 = scalar_select %p1921_p8, 1, 0 }
  0x10   : > { %p1506_p9 = pneg %p1921_p8  ;;  %s144_s25 = sshll.u32 %s1849_s24, 4  ;;  %s145_s25 = int_to_ptr.vmem [resolvable:$true] %s144_s25 }
  0x11   : > { %p1710_p13 = scmp.ne.s32.totalorder %s132_s22, %s1709_s26  ;;  %p1717_p5 = scmp.lt.s32.totalorder %s132_s22, %s132_s22 }
  0x12   : > { %p1930_p11 = pnand %p1506_p9, %p2209_p1  ;;  %p1718_p7 = scmp.lt.s32.totalorder %s1709_s26, %s1709_s26 }
  0x14   : > { %p1700_p12 = pneg %p1930_p11  ;;  %p1719_p10 = por %p1718_p7, %p1717_p5 }
  0x16   : > { %p1712_p0 = pnand %p1710_p13, %p1700_p12 }
  0x18   : > { %p1713_p3 = pneg %p1712_p0 }
  0x1a   : > { %p1720_p9 = pnand %p1719_p10, %p1713_p3 }
  0x1c   : > { %1723 = shalt.err (!%p1720_p9)
}
  0x1d   : > { %s1850_s27 = smov 256   ;;  %s1851_s28 = smov 16  }
  0x1e   : > { %1509 = dma.hbm_to_vmem [thread:$0]  (!%p1930_p11), %s2206_s1, 4096, %s132_s22, [#allocation6], %s1850_s27, %s1850_s27, %s1851_s28  }
  0x1f   : > { %s1735_s4 = scalar_lea.vmem %s145_s25, 2048  ;;  %p1743_p2 = scmp.lt.s32.totalorder %s145_s25, %s145_s25 }
  0x20   : > { %p1736_p1 = scmp.ne.s32.totalorder %s145_s25, %s1735_s4  ;;  %p1744_p6 = scmp.lt.s32.totalorder %s1735_s4, %s1735_s4 }
  0x22   : > { %p1738_p13 = pnand %p1736_p1, %p1700_p12  ;;  %p1745_p5 = por %p1744_p6, %p1743_p2 }
  0x24   : > { %p1739_p0 = pneg %p1738_p13 }
  0x26   : > { %p1746_p10 = pnand %p1745_p5, %p1739_p0 }
  0x28   : > { %1749 = shalt.err (!%p1746_p10)
}
  0x29   : > { %s1852_s5 = smov 64   ;;  %s1853_s6 = smov 4  }
  0x2a   : > { %1512 = dma.hbm_to_vmem [thread:$0]  (!%p1930_p11), %s2207_s2, 2048, %s145_s25, [#allocation6], %s1852_s5, %s1852_s5, %s1853_s6  }
  0x2b   : > { %s1953_s9 = sadd.s32 1, %s1846_s15   ;;  %s27_s11 = sadd.s32 1, %s1842_s14 }
  0x2c   : > { %s24_s10 = ssub.s32 %s1846_s15, %s1953_s9  ;;  %p34_p2 = scmp.ne.s32.totalorder %s1842_s14, %s1838_s13 }
  0x2d   : > { %p25_p1 = scmp.eq.s32.totalorder %s24_s10, 0  ;;  %p35_p6 = scmp.eq.s32.totalorder %s1846_s15, 0 }
  0x2e   : > { %p2217_p3 = scmp.eq.s32.totalorder %s1902_s16, 1  ;;  %p1523_p9 = scmp.lt.s32.totalorder %s1846_s15, 2 }
  0x2f   : > { %s1962_s17 = scalar_select %p25_p1, %s1842_s14, %s27_s11  }
  0x30   : > { %p36_p12 = por %p35_p6, %p34_p2  ;;  %p1966_p7 = por %p2217_p3, %p34_p2 }
  0x31   : > { %s158_s22 = sand.u32 1, %s1842_s14   ;;  %s1349_s24 = sshll.u32 %s1846_s15, 11 }
  0x32   : > { %s2218_s21 = scalar_select %p1966_p7, 1, 0 }
  0x33   : > { %s1256_s23 = sshll.u32 %s158_s22, 7  ;;  %s1976_s27 = scalar_lea.hbm %s2205_s0, %s1349_s24 }
  0x34   : > { %s162_s28 = scalar_lea.vmem [#allocation2], %s1256_s23  ;;  %p1980_p11 = pnand %p1523_p9, %p36_p12 }
  0x35   : > { %s169_s29 = sshll.u32 %s162_s28, 4  ;;  %s1984_s4 = scalar_lea.sflag [#allocation3], %s158_s22  ;;  %s1978_s29 = int_to_ptr.vmem [resolvable:$true] %s169_s29 }
  0x36   : > { %s1750_s5 = scalar_lea.hbm %s1976_s27, 2048  ;;  %p1752_p0 = pneg %p1980_p11 }
  0x37   : > { %p1751_p13 = scmp.ne.s32.totalorder %s1976_s27, %s1750_s5  ;;  %s1755_s8 = scalar_lea.hbm %s2205_s0, 4096 }
  0x38   : > { %p1756_p1 = scmp.lt.s32.totalorder %s1976_s27, %s2205_s0  ;;  %p1757_p2 = scmp.lt.s32.totalorder %s1755_s8, %s1750_s5 }
  0x39   : > { %p1753_p5 = pnand %p1752_p0, %p1751_p13 }
  0x3a   : > { %p1758_p6 = por %p1757_p2, %p1756_p1 }
  0x3b   : > { %p1754_p10 = pneg %p1753_p5 }
  0x3d   : > { %p1759_p12 = pnand %p1758_p6, %p1754_p10 }
  0x3f   : > { %1762 = shalt.err (!%p1759_p12)
}
  0x40   : > { %s1763_s22 = scalar_lea.vmem %s1978_s29, 2048  ;;  %s1854_s23 = smov [#allocation2]  }
  0x41   : > { %p1764_p3 = scmp.ne.s32.totalorder %s1978_s29, %s1763_s22  ;;  %s1768_s24 = sshll.u32 %s1854_s23, 4  ;;  %s1769_s24 = int_to_ptr.vmem [resolvable:$false] %s1768_s24 }
  0x42   : > { %s1770_s25 = scalar_lea.vmem %s1769_s24, 4096  ;;  %p1771_p5 = scmp.lt.s32.totalorder %s1978_s29, %s1769_s24 }
  0x43   : > { %p1766_p9 = pnand %p1764_p3, %p1752_p0  ;;  %p1772_p7 = scmp.lt.s32.totalorder %s1770_s25, %s1763_s22 }
  0x45   : > { %p1767_p13 = pneg %p1766_p9  ;;  %p1773_p4 = por %p1772_p7, %p1771_p5 }
  0x47   : > { %p1774_p8 = pnand %p1773_p4, %p1767_p13 }
  0x49   : > { %1777 = shalt.err (!%p1774_p8)
}
  0x4a   : > { %s1855_s26 = smov 128   ;;  %s1856_s28 = smov 8  }
  0x4b   : > { %1516 = dma.hbm_to_vmem [thread:$0]  (!%p1980_p11), %s1976_s27, 2048, %s1978_s29, %s1984_s4, %s1855_s26, %s1855_s26, %s1856_s28  }
  0x4c   : > { %p2220_p0 = scmp.ne.s32.totalorder %s2215_s20, 0 }
  0x4d   : > { %s2008_s5 = sand.u32 (!%p2220_p0), 1, %s1838_s13   ;;  %p2221_p4 = scmp.ne.s32.totalorder (!%p2220_p0), %s2213_s18, 0 }
  0x4e   : > { %181 = sbr.rel (%p2220_p0) target bundleno = 639 (0x27f), region = 32  ;;  %s1260_s6 = sshll.u32 (!%p2220_p0), %s2008_s5, 7 }
  0x4f   : > { %s184_s7 = scalar_lea.sflag (!%p2220_p0), [#allocation3], %s2008_s5  ;;  %s2012_s8 = scalar_lea.vmem (!%p2220_p0), [#allocation2], %s1260_s6 }
  0x53   : > { %1821 = dma.done.wait (%p2221_p4), %s184_s7, 2048  }
  0x54   : > { %1823 = vsyncadd (%p2221_p4), %s184_s7, 4294965248  ;;  %p2222_p8 = scmp.eq.s32.totalorder %s1902_s16, 0 }
  0x56   : > { %1825 = dma.done.wait (%p2222_p8), [#allocation6], 6144   ;;  %p2223_p7 = pmov %p2222_p8 }
  0x57   : > { %v1857_v0 = vmov 0   ;;  %v1570_v1 = vld [vmem:[#allocation5 + $0xe4] ss:$16 sps:$4 sm:$0xff]   ;;  %v1572_v2 = vld [vmem:[#allocation5 + $0xe0] ss:$16 sps:$4 sm:$0xff]   ;;  %v223_v18 = vld [vmem:[%s2012_s8 + $0x8] sm:$0xff] }
  0x58   : > { %1827 = vsyncadd (%p2223_p7), [#allocation6], 4294961152  ;;  %470 = vmatprep.mubr.bf16.mxu0 %v1857_v0  ;;  %510 = vmatprep.mubr.bf16.mxu1 %v1857_v0  ;;  %v1573_v3 = vld [vmem:[#allocation5 + $0xc4] ss:$16 sps:$4 sm:$0xff]   ;;  %v1575_v4 = vld [vmem:[#allocation5 + $0xc0] ss:$16 sps:$4 sm:$0xff]  }
  0x59   : > { %438 = vmatprep.subr.bf16.mxu0 %v1570_v1  ;;  %1478 = vmatprep.subr.bf16.mxu1 %v1570_v1  ;;  %v1576_v5 = vld [vmem:[#allocation5 + $0xa4] ss:$16 sps:$4 sm:$0xff]   ;;  %v1578_v6 = vld [vmem:[#allocation5 + $0xa0] ss:$16 sps:$4 sm:$0xff]   ;;  %v231_v20 = vld [vmem:[%s2012_s8 + $0x48] sm:$0xff]  ;;  %s1263_s18 = sshll.u32 %s2008_s5, 6 }
  0x5a   : > { %439 = vmatpush1.bf16.msra.mxu0 %v1572_v2  ;;  %1486 = vmatpush1.bf16.msra.mxu1 %v1572_v2  ;;  %v1579_v7 = vld [vmem:[#allocation5 + $0x84] ss:$16 sps:$4 sm:$0xff]   ;;  %v1581_v8 = vld [vmem:[#allocation5 + $0x80] ss:$16 sps:$4 sm:$0xff]   ;;  %v1596_v21 = vld [vmem:[#allocation5 + $0xec] ss:$16 sps:$4 sm:$0xff]  }
  0x5b   : > { %440 = vmatprep.subr.bf16.mxu0 %v1573_v3  ;;  %1479 = vmatprep.subr.bf16.mxu1 %v1573_v3  ;;  %v1582_v9 = vld [vmem:[#allocation5 + $0x64] ss:$16 sps:$4 sm:$0xff]   ;;  %v1584_v10 = vld [vmem:[#allocation5 + $0x60] ss:$16 sps:$4 sm:$0xff]   ;;  %v1594_v22 = vld [vmem:[#allocation5 + $0xe8] ss:$16 sps:$4 sm:$0xff]  }
  0x5c   : > { %v1585_v11 = vld [vmem:[#allocation5 + $0x44] ss:$16 sps:$4 sm:$0xff]   ;;  %v1587_v12 = vld [vmem:[#allocation5 + $0x40] ss:$16 sps:$4 sm:$0xff]   ;;  %v1599_v25 = vld [vmem:[#allocation5 + $0xcc] ss:$16 sps:$4 sm:$0xff]  }
  0x5d   : > { %v1588_v13 = vld [vmem:[#allocation5 + $0x24] ss:$16 sps:$4 sm:$0xff]   ;;  %v1590_v14 = vld [vmem:[#allocation5 + $0x20] ss:$16 sps:$4 sm:$0xff]   ;;  %v1597_v26 = vld [vmem:[#allocation5 + $0xc8] ss:$16 sps:$4 sm:$0xff]  }
  0x5e   : > { %441 = vmatpush1.bf16.msra.mxu0 %v1575_v4  ;;  %1487 = vmatpush1.bf16.msra.mxu1 %v1575_v4  ;;  %v1591_v15 = vld [vmem:[#allocation5 + $0x4] ss:$16 sps:$4 sm:$0xff]   ;;  %v1593_v16 = vld [vmem:[#allocation5] ss:$16 sps:$4 sm:$0xff]   ;;  %v225_v28 = vld [vmem:[%s2012_s8 + $0x18] sm:$0xff]  ;;  %s2145_s20 = scalar_lea.vmem [#allocation8], %s1263_s18 }
  0x5f   : > { %442 = vmatprep.subr.bf16.mxu0 %v1576_v5  ;;  %1480 = vmatprep.subr.bf16.mxu1 %v1576_v5  ;;  %v222_v17 = vld [vmem:[%s2012_s8] sm:$0xff]  ;;  %v224_v27 = vld [vmem:[%s2012_s8 + $0x10] sm:$0xff]  ;;  %v233_v30 = vld [vmem:[%s2012_s8 + $0x58] sm:$0xff]  ;;  %s1159_s27 = sshll.u32 %s2145_s20, 4  ;;  %s1366_s29 = sshll.u32 %s1902_s16, 10  ;;  %s2156_s27 = int_to_ptr.vmem [resolvable:$true] %s1159_s27 }
  0x60   : > { %v230_v19 = vld [vmem:[%s2012_s8 + $0x40] sm:$0xff]  ;;  %v2028_v23 = vpack.c.bf16 %v223_v18, %v222_v17  ;;  %v232_v29 = vld [vmem:[%s2012_s8 + $0x50] sm:$0xff]  ;;  %v1602_v31 = vld [vmem:[#allocation5 + $0xac] ss:$16 sps:$4 sm:$0xff]   ;;  %v239_v32 = vpack.c.bf16 %v225_v28, %v224_v27  ;;  %s2161_s10 = scalar_lea.hbm %s2208_s3, %s1366_s29  ;;  %s1146_s11 = scalar_lea.sflag [#allocation4], %s2008_s5 }
  0x61   : > { %v2030_v24 = vpack.c.bf16 %v231_v20, %v230_v19  ;;  %v243_v33 = vpack.c.bf16 %v233_v30, %v232_v29  ;;  %v1600_v34 = vld [vmem:[#allocation5 + $0xa8] ss:$16 sps:$4 sm:$0xff]   ;;  %v1605_v35 = vld [vmem:[#allocation5 + $0x8c] ss:$16 sps:$4 sm:$0xff]   ;;  %v226_v37 = vld [vmem:[%s2012_s8 + $0x20] sm:$0xff]  ;;  %s1778_s22 = scalar_lea.vmem %s2156_s27, 1024 }
  0x62   : > { %443 = vmatpush1.bf16.msra.mxu0 %v1578_v6  ;;  %1488 = vmatpush1.bf16.msra.mxu1 %v1578_v6  ;;  %v1603_v36 = vld [vmem:[#allocation5 + $0x88] ss:$16 sps:$4 sm:$0xff]   ;;  %v234_v39 = vld [vmem:[%s2012_s8 + $0x60] sm:$0xff]  ;;  %v1608_v41 = vld [vmem:[#allocation5 + $0x6c] ss:$16 sps:$4 sm:$0xff]   ;;  %p1779_p11 = scmp.ne.s32.totalorder %s2156_s27, %s1778_s22  ;;  %p2224_p10 = scmp.ne.s32.totalorder %s2218_s21, 0 }
  0x63   : > { %444 = vmatprep.subr.bf16.mxu0 %v1579_v7  ;;  %1481 = vmatprep.subr.bf16.mxu1 %v1579_v7  ;;  %v227_v38 = vld [vmem:[%s2012_s8 + $0x28] sm:$0xff]  ;;  %v228_v47 = vld [vmem:[%s2012_s8 + $0x30] sm:$0xff]  ;;  %v229_v48 = vld [vmem:[%s2012_s8 + $0x38] sm:$0xff]  ;;  %s1858_s16 = smov [#allocation8]  }
  0x64   : > { %v235_v40 = vld [vmem:[%s2012_s8 + $0x68] sm:$0xff]  ;;  %v240_v42 = vpack.c.bf16 %v227_v38, %v226_v37  ;;  %v236_v49 = vld [vmem:[%s2012_s8 + $0x70] sm:$0xff]  ;;  %v237_v50 = vld [vmem:[%s2012_s8 + $0x78] sm:$0xff]  ;;  %v241_v52 = vpack.c.bf16 %v229_v48, %v228_v47  ;;  %p1780_p1 = pnand %p1779_p11, %p2224_p10  ;;  %s1782_s23 = sshll.u32 %s1858_s16, 4  ;;  %s1783_s23 = int_to_ptr.vmem [resolvable:$false] %s1782_s23 }
  0x65   : > { %v244_v43 = vpack.c.bf16 %v235_v40, %v234_v39  ;;  %v1606_v44 = vld [vmem:[#allocation5 + $0x68] ss:$16 sps:$4 sm:$0xff]   ;;  %v1611_v45 = vld [vmem:[#allocation5 + $0x4c] ss:$16 sps:$4 sm:$0xff]   ;;  %v245_v53 = vpack.c.bf16 %v237_v50, %v236_v49  ;;  %v1620_v59 = vld [vmem:[#allocation7 + $0x70] sm:$0xff]   ;;  %s1784_s24 = scalar_lea.vmem %s1783_s23, 2048  ;;  %p1785_p6 = scmp.lt.s32.totalorder %s2156_s27, %s1783_s23 }
  0x66   : > { %445 = vmatpush1.bf16.msra.mxu0 %v1581_v8  ;;  %1489 = vmatpush1.bf16.msra.mxu1 %v1581_v8  ;;  %v1609_v46 = vld [vmem:[#allocation5 + $0x48] ss:$16 sps:$4 sm:$0xff]   ;;  %v1614_v51 = vld [vmem:[#allocation5 + $0x2c] ss:$16 sps:$4 sm:$0xff]   ;;  %v1621_v60 = vld [vmem:[#allocation7 + $0x30] sm:$0xff]   ;;  %p1781_p2 = pneg %p1780_p1  ;;  %p1786_p12 = scmp.lt.s32.totalorder %s1784_s24, %s1778_s22 }
  0x67   : > { %446 = vmatprep.subr.bf16.mxu0 %v1582_v9  ;;  %1482 = vmatprep.subr.bf16.mxu1 %v1582_v9  ;;  %v1612_v54 = vld [vmem:[#allocation5 + $0x28] ss:$16 sps:$4 sm:$0xff]   ;;  %v1617_v55 = vld [vmem:[#allocation5 + $0xc] ss:$16 sps:$4 sm:$0xff]   ;;  %v1624_v63 = vld [vmem:[#allocation7 + $0x60] sm:$0xff]  }
  0x68   : > { %v1615_v56 = vld [vmem:[#allocation5 + $0x8] ss:$16 sps:$4 sm:$0xff]   ;;  %v1625_v1 = vld [vmem:[#allocation7 + $0x20] sm:$0xff]   ;;  %v1629_v4 = vld [vmem:[#allocation7 + $0x10] sm:$0xff]   ;;  %p1787_p3 = por %p1786_p12, %p1785_p6 }
  0x69   : > { %v1618_v57 = vld [vmem:[#allocation7 + $0x78] sm:$0xff]   ;;  %v1622_v61 = vld [vmem:[#allocation7 + $0x68] sm:$0xff]   ;;  %v1632_v7 = vld [vmem:[#allocation7 + $0x40] sm:$0xff]  }
  0x6a   : > { %447 = vmatpush1.bf16.msra.mxu0 %v1584_v10  ;;  %1490 = vmatpush1.bf16.msra.mxu1 %v1584_v10  ;;  %v1619_v58 = vld [vmem:[#allocation7 + $0x38] sm:$0xff]   ;;  %v1623_v62 = vld [vmem:[#allocation7 + $0x28] sm:$0xff]   ;;  %v1633_v8 = vld [vmem:[#allocation7] sm:$0xff]   ;;  %p1788_p9 = pnand %p1787_p3, %p1781_p2 }
  0x6b   : > { %448 = vmatprep.subr.bf16.mxu0 %v1585_v11  ;;  %1483 = vmatprep.subr.bf16.mxu1 %v1585_v11  ;;  %v1626_v2 = vld [vmem:[#allocation7 + $0x58] sm:$0xff]   ;;  %v1630_v5 = vld [vmem:[#allocation7 + $0x48] sm:$0xff]  }
  0x6c   : > { %v1627_v3 = vld [vmem:[#allocation7 + $0x18] sm:$0xff]   ;;  %v1631_v6 = vld [vmem:[#allocation7 + $0x8] sm:$0xff]  }
  0x6e   : > { %449 = vmatpush1.bf16.msra.mxu0 %v1587_v12  ;;  %1491 = vmatpush1.bf16.msra.mxu1 %v1587_v12 }
  0x6f   : > { %450 = vmatprep.subr.bf16.mxu0 %v1588_v13  ;;  %1484 = vmatprep.subr.bf16.mxu1 %v1588_v13 }
  0x72   : > { %451 = vmatpush1.bf16.msra.mxu0 %v1590_v14  ;;  %1492 = vmatpush1.bf16.msra.mxu1 %v1590_v14 }
  0x73   : > { %452 = vmatprep.subr.bf16.mxu0 %v1591_v15  ;;  %1485 = vmatprep.subr.bf16.mxu1 %v1591_v15 }
  0x76   : > { %453 = vmatpush1.bf16.msra.mxu0 %v1593_v16  ;;  %1493 = vmatpush1.bf16.msra.mxu1 %v1593_v16 }
  0x77   : > { %551 = vmatprep.subr.bf16.mxu1 %v1596_v21  ;;  %1414 = vmatprep.subr.bf16.mxu0 %v1618_v57 }
  0x79   : > { %471 = vmatmul.mubr.bf16.vlgmr.msra.gmra.mxu0 %v2028_v23  ;;  %511 = vmatmul.mubr.bf16.vlgmr.msra.gmra.mxu1 %v2030_v24 }
  0x7a   : > { %552 = vmatpush1.bf16.msra.mxu1 %v1594_v22  ;;  %480 = vmatprep.mubr.bf16.mxu0 %v1857_v0 }
  0x7b   : > { %553 = vmatprep.subr.bf16.mxu1 %v1599_v25  ;;  %520 = vmatprep.mubr.bf16.mxu1 %v1857_v0 }
  0x7c   : > { %1415 = vmatpush3.bf16.msra.mxu0 %v1619_v58 }
  0x7d   : > { %1416 = vmatprep.subr.bf16.mxu0 %v1620_v59 }
  0x7e   : > { %554 = vmatpush1.bf16.msra.mxu1 %v1597_v26 }
  0x7f   : > { %555 = vmatprep.subr.bf16.mxu1 %v1602_v31 }
  0x80   : > { %1417 = vmatpush3.bf16.msra.mxu0 %v1621_v60 }
  0x81   : > { %481 = vmatmul.mubr.bf16.gmra.mxu0 %v239_v32  ;;  %521 = vmatmul.mubr.bf16.gmra.mxu1 %v243_v33 }
  0x82   : > { %556 = vmatpush1.bf16.msra.mxu1 %v1600_v34  ;;  %490 = vmatprep.mubr.bf16.mxu0 %v1857_v0 }
  0x83   : > { %557 = vmatprep.subr.bf16.mxu1 %v1605_v35  ;;  %530 = vmatprep.mubr.bf16.mxu1 %v1857_v0 }
  0x84   : > { %1418 = vmatprep.subr.bf16.mxu0 %v1622_v61 }
  0x85   : > { %1419 = vmatpush3.bf16.msra.mxu0 %v1623_v62 }
  0x86   : > { %558 = vmatpush1.bf16.msra.mxu1 %v1603_v36  ;;  %1420 = vmatprep.subr.bf16.mxu0 %v1624_v63 }
  0x87   : > { %559 = vmatprep.subr.bf16.mxu1 %v1608_v41 }
  0x89   : > { %491 = vmatmul.mubr.bf16.gmra.mxu0 %v240_v42  ;;  %531 = vmatmul.mubr.bf16.gmra.mxu1 %v244_v43 }
  0x8a   : > { %560 = vmatpush1.bf16.msra.mxu1 %v1606_v44  ;;  %500 = vmatprep.mubr.bf16.mxu0 %v1857_v0 }
  0x8b   : > { %561 = vmatprep.subr.bf16.mxu1 %v1611_v45  ;;  %540 = vmatprep.mubr.bf16.mxu1 %v1857_v0 }
  0x8c   : > { %1421 = vmatpush3.bf16.msra.mxu0 %v1625_v1 }
  0x8d   : > { %1422 = vmatprep.subr.bf16.mxu0 %v1626_v2 }
  0x8e   : > { %562 = vmatpush1.bf16.msra.mxu1 %v1609_v46 }
  0x8f   : > { %563 = vmatprep.subr.bf16.mxu1 %v1614_v51 }
  0x90   : > { %1423 = vmatpush3.bf16.msra.mxu0 %v1627_v3 }
  0x91   : > { %501 = vmatmul.mubr.bf16.gmra.mxu0 %v241_v52  ;;  %541 = vmatmul.mubr.bf16.gmra.mxu1 %v245_v53 }
  0x92   : > { %564 = vmatpush1.bf16.msra.mxu1 %v1612_v54  ;;  %583 = vmatprep.mubr.bf16.mxu1 %v1857_v0 }
  0x93   : > { %565 = vmatprep.subr.bf16.mxu1 %v1617_v55 }
  0x96   : > { %566 = vmatpush1.bf16.msra.mxu1 %v1615_v56 }
  0x99   : > { %584 = vmatmul.mubr.bf16.vlgmr.msra.gmra.mxu1 %v2028_v23 }
  0x9a   : > { %593 = vmatprep.mubr.bf16.mxu1 %v1857_v0 }
  0xa1   : > { %594 = vmatmul.mubr.bf16.gmra.mxu1 %v239_v32 }
  0xa2   : > { %603 = vmatprep.mubr.bf16.mxu1 %v1857_v0 }
  0xa9   : > { %604 = vmatmul.mubr.bf16.gmra.mxu1 %v240_v42 }
  0xaa   : > { %613 = vmatprep.mubr.bf16.mxu1 %v1857_v0 }
  0xb1   : > { %614 = vmatmul.mubr.bf16.gmra.mxu1 %v241_v52 }
  0xb2   : > { %623 = vmatprep.mubr.bf16.mxu1 %v1857_v0 }
  0xb9   : > { %624 = vmatmul.mubr.bf16.gmra.mxu1 %v2030_v24 }
  0xba   : > { %633 = vmatprep.mubr.bf16.mxu1 %v1857_v0 }
  0xc1   : > { %634 = vmatmul.mubr.bf16.gmra.mxu1 %v243_v33 }
  0xc2   : > { %643 = vmatprep.mubr.bf16.mxu1 %v1857_v0 }
  0xc9   : > { %644 = vmatmul.mubr.bf16.gmra.mxu1 %v244_v43 }
  0xca   : > { %653 = vmatprep.mubr.bf16.mxu1 %v1857_v0  ;;  %v1628_v0 = vld [vmem:[#allocation7 + $0x50] sm:$0xff]  }
  0xcb   : > { %1424 = vmatprep.subr.bf16.mxu0 %v1628_v0 }
  0xcc   : > { %1425 = vmatpush3.bf16.msra.mxu0 %v1629_v4 }
  0xcd   : > { %1426 = vmatprep.subr.bf16.mxu0 %v1630_v5 }
  0xd0   : > { %1427 = vmatpush3.bf16.msra.mxu0 %v1631_v6 }
  0xd1   : > { %654 = vmatmul.mubr.bf16.gmra.mxu1 %v245_v53  ;;  %1428 = vmatprep.subr.bf16.mxu0 %v1632_v7 }
  0xd4   : > { %1429 = vmatpush3.bf16.msra.mxu0 %v1633_v8 }
 0x139   : > { %v472_v9 = vpop.f32.mrf.mxu0  ;;  %v2062_v10 = vpop.f32.mrf.mxu1 }
 0x13b   : > { %v474_v11 = vpop.f32.mrf.mxu0  ;;  %v514_v12 = vpop.f32.mrf.mxu1 }
 0x13d   : > { %v476_v13 = vpop.f32.mrf.mxu0  ;;  %v516_v14 = vpop.f32.mrf.mxu1 }
 0x13e   : > { %v2064_v15 = vpack.c.bf16 %v476_v13, %v472_v9  ;;  %v2103_v1 = vpack.c.bf16 %v516_v14, %v2062_v10 }
 0x13f   : > { %v478_v16 = vpop.f32.mrf.mxu0  ;;  %v518_v17 = vpop.f32.mrf.mxu1 }
 0x140   : > { %v1296_v18 = vmul.bf16 3216621497, %v2064_v15  ;;  %v2067_v19 = vpack.c.bf16 %v478_v16, %v474_v11  ;;  %v2084_v40 = vpack.c.bf16 %v518_v17, %v514_v12  ;;  %v1304_v8 = vmul.bf16 3216621497, %v2103_v1 }
 0x141   : > { %v482_v20 = vpop.f32.mrf.mxu0  ;;  %v2069_v21 = vpop.f32.mrf.mxu1 }
 0x142   : > { %1634 = vpow.bf16 %v1296_v18  ;;  %v1297_v22 = vmul.bf16 3216621497, %v2067_v19  ;;  %v1305_v51 = vmul.bf16 3216621497, %v2084_v40 }
 0x143   : > { %v484_v23 = vpop.f32.mrf.mxu0  ;;  %v524_v24 = vpop.f32.mrf.mxu1 }
 0x144   : > { %1636 = vpow.bf16 %v1297_v22 }
 0x145   : > { %v486_v25 = vpop.f32.mrf.mxu0  ;;  %v526_v26 = vpop.f32.mrf.mxu1 }
 0x146   : > { %v2072_v27 = vpack.c.bf16 %v486_v25, %v482_v20  ;;  %v2109_v11 = vpack.c.bf16 %v526_v26, %v2069_v21 }
 0x147   : > { %v488_v28 = vpop.f32.mrf.mxu0  ;;  %v528_v29 = vpop.f32.mrf.mxu1 }
 0x148   : > { %v1298_v30 = vmul.bf16 3216621497, %v2072_v27  ;;  %v2075_v31 = vpack.c.bf16 %v488_v28, %v484_v23  ;;  %v2097_v58 = vpack.c.bf16 %v528_v29, %v524_v24  ;;  %v1306_v22 = vmul.bf16 3216621497, %v2109_v11 }
 0x149   : > { %v492_v32 = vpop.f32.mrf.mxu0  ;;  %v2077_v33 = vpop.f32.mrf.mxu1 }
 0x14a   : > { %1638 = vpow.bf16 %v1298_v30  ;;  %v1299_v34 = vmul.bf16 3216621497, %v2075_v31  ;;  %v1307_v5 = vmul.bf16 3216621497, %v2097_v58 }
 0x14b   : > { %v494_v35 = vpop.f32.mrf.mxu0  ;;  %v534_v36 = vpop.f32.mrf.mxu1 }
 0x14c   : > { %1640 = vpow.bf16 %v1299_v34 }
 0x14d   : > { %v496_v37 = vpop.f32.mrf.mxu0  ;;  %v2080_v38 = vpop.f32.mrf.mxu1 }
 0x14e   : > { %v2082_v39 = vpack.c.bf16 %v496_v37, %v492_v32  ;;  %v2119_v34 = vpack.c.bf16 %v2080_v38, %v2077_v33 }
 0x14f   : > { %v498_v41 = vpop.f32.mrf.mxu0  ;;  %v538_v42 = vpop.f32.mrf.mxu1 }
 0x150   : > { %v1635_v43 = vpop.eup %1634  ;;  %v1300_v44 = vmul.bf16 3216621497, %v2082_v39  ;;  %v2087_v45 = vpack.c.bf16 %v498_v41, %v494_v35  ;;  %v2111_v13 = vpack.c.bf16 %v538_v42, %v534_v36  ;;  %v1308_v33 = vmul.bf16 3216621497, %v2119_v34 }
 0x151   : > { %v760_v46 = vadd.bf16 1065369472, %v1635_v43  ;;  %v502_v47 = vpop.f32.mrf.mxu0  ;;  %v2089_v48 = vpop.f32.mrf.mxu1 }
 0x152   : > { %v1637_v49 = vpop.eup %1636  ;;  %1642 = vpow.bf16 %v1300_v44  ;;  %v1301_v54 = vmul.bf16 3216621497, %v2087_v45  ;;  %v1309_v21 = vmul.bf16 3216621497, %v2111_v13 }
 0x153   : > { %1644 = vrcp.bf16 %v760_v46  ;;  %v761_v50 = vadd.bf16 1065369472, %v1637_v49  ;;  %v504_v52 = vpop.f32.mrf.mxu0  ;;  %v544_v53 = vpop.f32.mrf.mxu1 }
 0x155   : > { %1646 = vrcp.bf16 %v761_v50  ;;  %v506_v55 = vpop.f32.mrf.mxu0  ;;  %v2093_v56 = vpop.f32.mrf.mxu1 }
 0x156   : > { %v2095_v57 = vpack.c.bf16 %v506_v55, %v502_v47  ;;  %1648 = vpow.bf16 %v1305_v51 }
 0x157   : > { %v508_v59 = vpop.f32.mrf.mxu0  ;;  %v548_v60 = vpop.f32.mrf.mxu1  ;;  %1650 = vpow.bf16 %v1301_v54 }
 0x158   : > { %v1639_v61 = vpop.eup %1638  ;;  %v1302_v62 = vmul.bf16 3216621497, %v2095_v57  ;;  %v2100_v63 = vpack.c.bf16 %v508_v59, %v504_v52  ;;  %v2121_v42 = vpack.c.bf16 %v548_v60, %v544_v53 }
 0x159   : > { %v762_v2 = vadd.bf16 1065369472, %v1639_v61  ;;  %v585_v3 = vpop.f32.mrf.mxu1 }
 0x15a   : > { %v1641_v0 = vpop.eup %1640  ;;  %1652 = vpow.bf16 %v1302_v62  ;;  %v1303_v7 = vmul.bf16 3216621497, %v2100_v63  ;;  %v1311_v52 = vmul.bf16 3216621497, %v2121_v42 }
 0x15b   : > { %1654 = vrcp.bf16 %v762_v2  ;;  %v763_v4 = vadd.bf16 1065369472, %v1641_v0  ;;  %v587_v6 = vpop.f32.mrf.mxu1 }
 0x15d   : > { %1656 = vrcp.bf16 %v763_v4  ;;  %v589_v9 = vpop.f32.mrf.mxu1 }
 0x15e   : > { %1658 = vpow.bf16 %v1307_v5  ;;  %v680_v36 = vpack.c.bf16 %v589_v9, %v585_v3 }
 0x15f   : > { %v591_v10 = vpop.f32.mrf.mxu1  ;;  %1660 = vpow.bf16 %v1303_v7 }
 0x160   : > { %v1643_v12 = vpop.eup %1642  ;;  %1662 = vpow.bf16 %v1304_v8  ;;  %v681_v32 = vpack.c.bf16 %v591_v10, %v587_v6  ;;  %v2129_v6 = vpack.c.bf16 %v2093_v56, %v2089_v48 }
 0x161   : > { %v1645_v14 = vpop.eup %1644  ;;  %v764_v16 = vadd.bf16 1065369472, %v1643_v12  ;;  %v595_v17 = vpop.f32.mrf.mxu1 }
 0x162   : > { %v777_v18 = vmul.bf16 1065369472, %v1645_v14  ;;  %v1310_v14 = vmul.bf16 3216621497, %v2129_v6 }
 0x163   : > { %v1647_v20 = vpop.eup %1646  ;;  %v597_v23 = vpop.f32.mrf.mxu1  ;;  %1664 = vrcp.bf16 %v764_v16 }
 0x164   : > { %v779_v24 = vmul.bf16 1065369472, %v1647_v20  ;;  %v1649_v25 = vpop.eup %1648  ;;  %v808_v26 = vmul.bf16 %v777_v18, %v2064_v15  ;;  %1666 = vpow.bf16 %v1306_v22 }
 0x165   : > { %v599_v28 = vpop.f32.mrf.mxu1  ;;  %v1651_v29 = vpop.eup %1650  ;;  %1668 = vpow.bf16 %v1309_v21  ;;  %v769_v15 = vadd.bf16 1065369472, %v1649_v25 }
 0x166   : > { %v809_v30 = vmul.bf16 %v779_v24, %v2067_v19  ;;  %v765_v35 = vadd.bf16 1065369472, %v1651_v29  ;;  %v824_v47 = vmul.bf16 %v808_v26, %v680_v36  ;;  %v682_v3 = vpack.c.bf16 %v599_v28, %v595_v17 }
 0x167   : > { %v601_v37 = vpop.f32.mrf.mxu1 }
 0x168   : > { %v1653_v41 = vpop.eup %1652  ;;  %v825_v43 = vmul.bf16 %v809_v30, %v681_v32  ;;  %1670 = vrcp.bf16 %v765_v35  ;;  %v683_v61 = vpack.c.bf16 %v601_v37, %v597_v23 }
 0x169   : > { %v1655_v44 = vpop.eup %1654  ;;  %v766_v46 = vadd.bf16 1065369472, %v1653_v41  ;;  %v605_v19 = vpop.f32.mrf.mxu1 }
 0x16a   : > { %v781_v49 = vmul.bf16 1065369472, %v1655_v44  ;;  %1000 = vmatprep.mubr.bf16.mxu0 %v825_v43 }
 0x16b   : > { %v1657_v50 = vpop.eup %1656  ;;  %v607_v38 = vpop.f32.mrf.mxu1  ;;  %1001 = vmatmul.mubr.bf16.vlgmr.msra.gmra.mxu0 %v824_v47  ;;  %1672 = vrcp.bf16 %v766_v46 }
 0x16c   : > { %v783_v51 = vmul.bf16 1065369472, %v1657_v50  ;;  %v1659_v53 = vpop.eup %1658  ;;  %1674 = vrcp.bf16 %v769_v15  ;;  %v810_v54 = vmul.bf16 %v781_v49, %v2072_v27 }
 0x16d   : > { %v609_v55 = vpop.f32.mrf.mxu1  ;;  %v1661_v59 = vpop.eup %1660  ;;  %1676 = vpow.bf16 %v1308_v33  ;;  %v771_v5 = vadd.bf16 1065369472, %v1659_v53 }
 0x16e   : > { %v811_v60 = vmul.bf16 %v783_v51, %v2075_v31  ;;  %v1663_v62 = vpop.eup %1662  ;;  %v767_v2 = vadd.bf16 1065369472, %v1661_v59  ;;  %1678 = vpow.bf16 %v1311_v52  ;;  %v826_v7 = vmul.bf16 %v810_v54, %v682_v3 }
 0x16f   : > { %v611_v0 = vpop.f32.mrf.mxu1  ;;  %v768_v9 = vadd.bf16 1065369472, %v1663_v62  ;;  %v684_v29 = vpack.c.bf16 %v609_v55, %v605_v19 }
 0x170   : > { %v827_v4 = vmul.bf16 %v811_v60, %v683_v61  ;;  %1680 = vrcp.bf16 %v767_v2  ;;  %v685_v26 = vpack.c.bf16 %v611_v0, %v607_v38 }
 0x171   : > { %v615_v27 = vpop.f32.mrf.mxu1  ;;  %v1665_v8 = vpop.eup %1664  ;;  %1682 = vrcp.bf16 %v771_v5 }
 0x172   : > { %1008 = vmatprep.mubr.bf16.mxu0 %v827_v4  ;;  %v1667_v10 = vpop.eup %1666  ;;  %v785_v12 = vmul.bf16 1065369472, %v1665_v8  ;;  %1684 = vrcp.bf16 %v768_v9 }
 0x173   : > { %v617_v31 = vpop.f32.mrf.mxu1  ;;  %1009 = vmatmul.mubr.bf16.gmra.mxu0 %v826_v7  ;;  %v1669_v17 = vpop.eup %1668  ;;  %1686 = vpow.bf16 %v1310_v14  ;;  %v770_v21 = vadd.bf16 1065369472, %v1667_v10 }
 0x174   : > { %v812_v56 = vmul.bf16 %v785_v12, %v2082_v39  ;;  %v773_v22 = vadd.bf16 1065369472, %v1669_v17 }
 0x175   : > { %v619_v16 = vpop.f32.mrf.mxu1 }
 0x176   : > { %v1671_v18 = vpop.eup %1670  ;;  %1688 = vrcp.bf16 %v773_v22  ;;  %v828_v37 = vmul.bf16 %v812_v56, %v684_v29  ;;  %v686_v53 = vpack.c.bf16 %v619_v16, %v615_v27 }
 0x177   : > { %v621_v20 = vpop.f32.mrf.mxu1  ;;  %v787_v48 = vmul.bf16 1065369472, %v1671_v18  ;;  %1690 = vrcp.bf16 %v770_v21 }
 0x178   : > { %v687_v51 = vpack.c.bf16 %v621_v20, %v617_v31 }
 0x179   : > { %v625_v23 = vpop.f32.mrf.mxu1  ;;  %v1673_v24 = vpop.eup %1672  ;;  %v813_v25 = vmul.bf16 %v787_v48, %v2087_v45 }
 0x17a   : > { %v1675_v28 = vpop.eup %1674  ;;  %v789_v36 = vmul.bf16 1065369472, %v1673_v24 }
 0x17b   : > { %v627_v30 = vpop.f32.mrf.mxu1  ;;  %v829_v32 = vmul.bf16 %v813_v25, %v685_v26  ;;  %v1677_v35 = vpop.eup %1676  ;;  %v795_v44 = vmul.bf16 1065369472, %v1675_v28 }
 0x17c   : > { %v1679_v43 = vpop.eup %1678  ;;  %v814_v45 = vmul.bf16 %v789_v36, %v2095_v57  ;;  %v772_v33 = vadd.bf16 1065369472, %v1677_v35 }
 0x17d   : > { %v629_v41 = vpop.f32.mrf.mxu1  ;;  %1016 = vmatprep.mubr.bf16.mxu0 %v829_v32  ;;  %v775_v49 = vadd.bf16 1065369472, %v1679_v43  ;;  %v817_v50 = vmul.bf16 %v795_v44, %v2084_v40 }
 0x17e   : > { %v1681_v39 = vpop.eup %1680  ;;  %1017 = vmatmul.mubr.bf16.gmra.mxu0 %v828_v37  ;;  %v830_v61 = vmul.bf16 %v814_v45, %v686_v53 }
 0x17f   : > { %v631_v15 = vpop.f32.mrf.mxu1  ;;  %v791_v46 = vmul.bf16 1065369472, %v1681_v39  ;;  %v1683_v52 = vpop.eup %1682  ;;  %1692 = vrcp.bf16 %v775_v49 }
 0x180   : > { %v689_v47 = vpack.c.bf16 %v631_v15, %v627_v30  ;;  %v1685_v55 = vpop.eup %1684  ;;  %v799_v2 = vmul.bf16 1065369472, %v1683_v52  ;;  %1694 = vrcp.bf16 %v772_v33 }
 0x181   : > { %v635_v19 = vpop.f32.mrf.mxu1  ;;  %v815_v38 = vmul.bf16 %v791_v46, %v2100_v63  ;;  %v1687_v57 = vpop.eup %1686  ;;  %v793_v3 = vmul.bf16 1065369472, %v1685_v55  ;;  %v688_v63 = vpack.c.bf16 %v629_v41, %v625_v23 }
 0x182   : > { %v833_v60 = vmul.bf16 %v817_v50, %v689_v47  ;;  %v819_v5 = vmul.bf16 %v799_v2, %v2097_v58  ;;  %v774_v7 = vadd.bf16 1065369472, %v1687_v57 }
 0x183   : > { %v637_v54 = vpop.f32.mrf.mxu1  ;;  %v831_v59 = vmul.bf16 %v815_v38, %v687_v51  ;;  %v816_v8 = vmul.bf16 %v793_v3, %v2103_v1 }
 0x184   : > { %v1689_v27 = vpop.eup %1688  ;;  %1696 = vrcp.bf16 %v774_v7 }
 0x185   : > { %v639_v62 = vpop.f32.mrf.mxu1  ;;  %1024 = vmatprep.mubr.bf16.mxu0 %v831_v59  ;;  %v1691_v31 = vpop.eup %1690  ;;  %v832_v12 = vmul.bf16 %v816_v8, %v688_v63  ;;  %v803_v16 = vmul.bf16 1065369472, %v1689_v27 }
 0x186   : > { %1025 = vmatmul.mubr.bf16.gmra.mxu0 %v830_v61  ;;  %v797_v17 = vmul.bf16 1065369472, %v1691_v31  ;;  %v690_v48 = vpack.c.bf16 %v639_v62, %v635_v19 }
 0x187   : > { %v641_v40 = vpop.f32.mrf.mxu1  ;;  %1032 = vmatprep.mubr.bf16.mxu0 %v833_v60  ;;  %v821_v58 = vmul.bf16 %v803_v16, %v2111_v13 }
 0x188   : > { %v691_v0 = vpack.c.bf16 %v641_v40, %v637_v54  ;;  %v818_v23 = vmul.bf16 %v797_v17, %v2109_v11 }
 0x189   : > { %v645_v4 = vpop.f32.mrf.mxu1 }
 0x18a   : > { %v835_v10 = vmul.bf16 %v819_v5, %v691_v0  ;;  %v834_v25 = vmul.bf16 %v818_v23, %v690_v48 }
 0x18b   : > { %v647_v9 = vpop.f32.mrf.mxu1 }
 0x18d   : > { %v649_v14 = vpop.f32.mrf.mxu1  ;;  %v1693_v22 = vpop.eup %1692 }
 0x18e   : > { %1033 = vmatmul.mubr.bf16.gmra.mxu0 %v832_v12  ;;  %v1695_v24 = vpop.eup %1694  ;;  %v807_v28 = vmul.bf16 1065369472, %v1693_v22  ;;  %v692_v35 = vpack.c.bf16 %v649_v14, %v645_v4 }
 0x18f   : > { %v651_v18 = vpop.f32.mrf.mxu1  ;;  %1040 = vmatprep.mubr.bf16.mxu0 %v835_v10  ;;  %v801_v29 = vmul.bf16 1065369472, %v1695_v24 }
 0x190   : > { %v693_v20 = vpack.c.bf16 %v651_v18, %v647_v9  ;;  %v823_v36 = vmul.bf16 %v807_v28, %v2121_v42 }
 0x191   : > { %v655_v56 = vpop.f32.mrf.mxu1  ;;  %v820_v13 = vmul.bf16 %v801_v29, %v2119_v34 }
 0x192   : > { %v837_v21 = vmul.bf16 %v821_v58, %v693_v20  ;;  %v1697_v37 = vpop.eup %1696 }
 0x193   : > { %v657_v1 = vpop.f32.mrf.mxu1  ;;  %v836_v11 = vmul.bf16 %v820_v13, %v692_v35  ;;  %v805_v43 = vmul.bf16 1065369472, %v1697_v37 }
 0x195   : > { %v659_v26 = vpop.f32.mrf.mxu1  ;;  %v822_v39 = vmul.bf16 %v805_v43, %v2129_v6 }
 0x196   : > { %1041 = vmatmul.mubr.bf16.gmra.mxu0 %v834_v25  ;;  %v694_v44 = vpack.c.bf16 %v659_v26, %v655_v56 }
 0x197   : > { %v661_v30 = vpop.f32.mrf.mxu1  ;;  %1048 = vmatprep.mubr.bf16.mxu0 %v837_v21 }
 0x198   : > { %v695_v32 = vpack.c.bf16 %v661_v30, %v657_v1  ;;  %v838_v15 = vmul.bf16 %v822_v39, %v694_v44 }
 0x19a   : > { %v839_v41 = vmul.bf16 %v823_v36, %v695_v32 }
 0x19e   : > { %1049 = vmatmul.mubr.bf16.gmra.mxu0 %v836_v11 }
 0x19f   : > { %1056 = vmatprep.mubr.bf16.mxu0 %v839_v41 }
 0x1a6   : > { %1057 = vmatmul.mubr.bf16.gmra.mxu0 %v838_v15 }
 0x22b   : > { %v1430_v46 = vpop.f32.mrf.mxu0 }
 0x22d   : > { %v1431_v47 = vpop.f32.mrf.mxu0 }
 0x22e   : > { %v1432_v19 = vadd.f32 %v1431_v47, %v1430_v46 }
 0x22f   : > { %v1433_v45 = vpop.f32.mrf.mxu0 }
 0x231   : > { %v1434_v49 = vpop.f32.mrf.mxu0 }
 0x232   : > { %v1435_v42 = vadd.f32 %v1434_v49, %v1433_v45 }
 0x233   : > { %v1436_v50 = vpop.f32.mrf.mxu0 }
 0x234   : > { %v1370_v34 = vpack.c.bf16 %v1435_v42, %v1432_v19 }
 0x235   : > { %v1437_v33 = vpop.f32.mrf.mxu0 }
 0x236   : > { %1371 = vst [vmem:[%s2145_s20] sm:$0xff] %v1370_v34   ;;  %v1438_v51 = vadd.f32 %v1437_v33, %v1436_v50 }
 0x237   : > { %v1439_v38 = vpop.f32.mrf.mxu0 }
 0x239   : > { %v1440_v6 = vpop.f32.mrf.mxu0 }
 0x23a   : > { %v1441_v52 = vadd.f32 %v1440_v6, %v1439_v38 }
 0x23c   : > { %v1375_v53 = vpack.c.bf16 %v1441_v52, %v1438_v51 }
 0x23e   : > { %1407 = vst [vmem:[%s2145_s20 + $0x8] sm:$0xff] %v1375_v53   ;;  %v1442_v54 = vpop.f32.mrf.mxu0 }
 0x240   : > { %v1443_v55 = vpop.f32.mrf.mxu0 }
 0x241   : > { %v1444_v61 = vadd.f32 %v1443_v55, %v1442_v54 }
 0x242   : > { %v1445_v59 = vpop.f32.mrf.mxu0 }
 0x244   : > { %v1446_v60 = vpop.f32.mrf.mxu0 }
 0x245   : > { %v1447_v62 = vadd.f32 %v1446_v60, %v1445_v59 }
 0x246   : > { %v1448_v2 = vpop.f32.mrf.mxu0 }
 0x247   : > { %v1380_v57 = vpack.c.bf16 %v1447_v62, %v1444_v61 }
 0x248   : > { %v1449_v3 = vpop.f32.mrf.mxu0 }
 0x249   : > { %1408 = vst [vmem:[%s2145_s20 + $0x10] sm:$0xff] %v1380_v57   ;;  %v1450_v63 = vadd.f32 %v1449_v3, %v1448_v2 }
 0x24a   : > { %v1451_v40 = vpop.f32.mrf.mxu0 }
 0x24c   : > { %v1452_v0 = vpop.f32.mrf.mxu0 }
 0x24d   : > { %v1453_v4 = vadd.f32 %v1452_v0, %v1451_v40 }
 0x24e   : > { %v1454_v5 = vpop.f32.mrf.mxu0 }
 0x24f   : > { %v1385_v7 = vpack.c.bf16 %v1453_v4, %v1450_v63 }
 0x250   : > { %v1455_v27 = vpop.f32.mrf.mxu0 }
 0x251   : > { %1409 = vst [vmem:[%s2145_s20 + $0x18] sm:$0xff] %v1385_v7   ;;  %v1456_v31 = vadd.f32 %v1455_v27, %v1454_v5 }
 0x252   : > { %v1457_v8 = vpop.f32.mrf.mxu0 }
 0x254   : > { %v1458_v9 = vpop.f32.mrf.mxu0 }
 0x255   : > { %v1459_v10 = vadd.f32 %v1458_v9, %v1457_v8 }
 0x256   : > { %v1460_v12 = vpop.f32.mrf.mxu0 }
 0x257   : > { %v1390_v14 = vpack.c.bf16 %v1459_v10, %v1456_v31 }
 0x258   : > { %v1461_v16 = vpop.f32.mrf.mxu0 }
 0x259   : > { %1410 = vst [vmem:[%s2145_s20 + $0x20] sm:$0xff] %v1390_v14   ;;  %v1462_v20 = vadd.f32 %v1461_v16, %v1460_v12 }
 0x25a   : > { %v1463_v17 = vpop.f32.mrf.mxu0 }
 0x25c   : > { %v1464_v18 = vpop.f32.mrf.mxu0 }
 0x25d   : > { %v1465_v48 = vadd.f32 %v1464_v18, %v1463_v17 }
 0x25e   : > { %v1466_v56 = vpop.f32.mrf.mxu0 }
 0x25f   : > { %v1395_v58 = vpack.c.bf16 %v1465_v48, %v1462_v20 }
 0x260   : > { %v1467_v22 = vpop.f32.mrf.mxu0 }
 0x261   : > { %1411 = vst [vmem:[%s2145_s20 + $0x28] sm:$0xff] %v1395_v58   ;;  %v1468_v24 = vadd.f32 %v1467_v22, %v1466_v56 }
 0x262   : > { %v1469_v23 = vpop.f32.mrf.mxu0 }
 0x264   : > { %v1470_v1 = vpop.f32.mrf.mxu0 }
 0x265   : > { %v1471_v21 = vadd.f32 %v1470_v1, %v1469_v23 }
 0x266   : > { %v1472_v25 = vpop.f32.mrf.mxu0 }
 0x267   : > { %v1400_v26 = vpack.c.bf16 %v1471_v21, %v1468_v24 }
 0x268   : > { %v1473_v28 = vpop.f32.mrf.mxu0 }
 0x269   : > { %1412 = vst [vmem:[%s2145_s20 + $0x30] sm:$0xff] %v1400_v26   ;;  %v1474_v32 = vadd.f32 %v1473_v28, %v1472_v25 }
 0x26a   : > { %v1475_v29 = vpop.f32.mrf.mxu0 }
 0x26c   : > { %v1476_v30 = vpop.f32.mrf.mxu0 }
 0x26d   : > { %v1477_v35 = vadd.f32 %v1476_v30, %v1475_v29 }
 0x26f   : > { %v1405_v36 = vpack.c.bf16 %v1477_v35, %v1474_v32 }
 0x271   : > { %1413 = vst [vmem:[%s2145_s20 + $0x38] sm:$0xff] %v1405_v36  }
 0x272   : > { %1791 = shalt.err (!%p1788_p9)
}
 0x273   : > { %s1792_s25 = scalar_lea.hbm %s2161_s10, 1024  ;;  %s1796_s6 = scalar_lea.hbm %s2208_s3, 2048 }
 0x274   : > { %p1793_p13 = scmp.ne.s32.totalorder %s2161_s10, %s1792_s25  ;;  %p1797_p4 = scmp.lt.s32.totalorder %s2161_s10, %s2208_s3 }
 0x275   : > { %p1798_p8 = scmp.lt.s32.totalorder %s1796_s6, %s1792_s25 }
 0x276   : > { %p1794_p5 = pnand %p1793_p13, %p2224_p10 }
 0x277   : > { %p1799_p7 = por %p1798_p8, %p1797_p4 }
 0x278   : > { %p1795_p0 = pneg %p1794_p5 }
 0x27a   : > { %p1800_p11 = pnand %p1799_p7, %p1795_p0 }
 0x27c   : > { %1803 = shalt.err (!%p1800_p11)
}
 0x27d   : > { %s1859_s18 = smov 64   ;;  %s1860_s20 = smov 4  }
 0x27e   : > { %1504 = dma.vmem_to_hbm [thread:$0]  (%p2224_p10), %s2156_s27, 1024, %s2161_s10, %s1146_s11, %s1859_s18, %s1859_s18, %s1860_s20  }
 0x27f PF: > { %s1174_s29 = sand.u32 1, %s1834_s12   ;;  %p2225_p1 = scmp.ne.s32.totalorder %s2214_s19, 0 }
 0x280   : > { %p2226_p2 = scmp.ge.s32.totalorder %s1846_s15, 2  ;;  %s1175_s30 = scalar_lea.sflag [#allocation4], %s1174_s29 }
 0x282   : > { %p1518_p6 = pnand %p2226_p2, %p2225_p1 }
 0x284   : > { %p1519_p12 = pneg %p1518_p6 }
 0x286   : > { %1829 = dma.done.wait (%p1519_p12), %s1175_s30, 1024  }
 0x287   : > { %1831 = vsyncadd (%p1519_p12), %s1175_s30, 4294966272  ;;  %p17_p3 = scmp.ge.s32.totalorder %s1953_s9, 4   ;;  %s2227_s12 = smov %s1838_s13 }
 0x288   : > { %s2228_s13 = smov %s1842_s14  ;;  %s2229_s14 = smov %s1962_s17 }
 0x289   : > { %s2230_s15 = smov %s1953_s9  ;;  %19 = sbr.rel (!%p17_p3) target bundleno = 6 (0x6), region = 85 }
 0x28e   :  { %1180 = vsyncpa [#allocation3], 1 }
 0x28f   :  { %1182 = vsyncpa [#allocation3 + $0x1], 1 }
 0x290   :  { %1183 = vsyncpa [#allocation6], 1 }
 0x291   :  { %1184 = vsyncpa [#allocation4], 1 }
 0x292   :  { %1186 = vsyncpa [#allocation4 + $0x1], 1 }

</bundles_post_ra>
